<compile_context>
chip_gen: v5e
topology: v5e:2x2
jax: 0.10.0
libtpu: 0.0.40
codegen_flags: <defaults>
</compile_context>

<pallas_src>
import functools
import math

import jax
import jax.numpy as jnp
from jax.experimental import pallas as pl
from jax.experimental.pallas import tpu as pltpu


def _round_up(x, m):
    return ((x + m - 1) // m) * m


def _sublane_multiple(dtype):
    # f32 -> 8, bf16 -> 16, int8/fp8 -> 32 (second-to-last-dim tiling constraint).
    return max(8, 32 // jnp.dtype(dtype).itemsize)


def _pack_factor(isize, osize):
    # Smallest row-pack factor p so both p*isize and p*osize are lane-dense
    # (multiples of 128).  None -> shapes too awkward, use the XLA fallback.
    p = math.lcm(128 // math.gcd(isize, 128), 128 // math.gcd(osize, 128))
    return p if p * max(isize, osize) <= 4096 else None


def packed_linear_kernel(x_ref, w_ref, b_ref, o_ref):
    # x_ref: (tb, P*isize)   w_ref: (P*isize, P*osize)  block-diag W^T, (K,N) layout
    # b_ref: (1, P*osize)    o_ref: (tb, P*osize)
    acc = jnp.dot(x_ref[...], w_ref[...], preferred_element_type=jnp.float32)
    o_ref[...] = (acc + b_ref[...].astype(jnp.float32)).astype(o_ref.dtype)


@functools.partial(jax.jit, static_argnames=("block_b",))
def multivariate_regression_forward(x, weight, bias, *, block_b=32768):
    """x: (B, isize); weight: (osize, isize) (torch.nn.Linear layout); bias: (osize,)."""
    B, isize = x.shape
    osize = weight.shape[0]

    pack = _pack_factor(isize, osize)
    if pack is None or B < pack:
        # Degenerate / tiny shapes: negligible work, plain XLA.
        return (x @ weight.T + bias).astype(x.dtype)

    b_main = (B // pack) * pack            # rows that pack cleanly
    bp = b_main // pack                    # packed rows
    kp, np_ = pack * isize, pack * osize   # lane-dense K / N (multiples of 128)

    # Tiny per-call packed operands (built in (K, N) layout -> no transpose anywhere).
    w_packed = jnp.kron(jnp.eye(pack, dtype=weight.dtype), weight.T)   # (kp, np_)
    b_packed = jnp.tile(bias, pack).reshape(1, np_)

    x_main = x if b_main == B else x[:b_main]
    x_packed = x_main.reshape(bp, kp)      # pure bitcast when b_main == B

    sub = _sublane_multiple(x.dtype)
    tb_cap = max(sub, _round_up(max(block_b // pack, 1), sub))
    if bp <= sub:
        tb = bp                            # single block == whole (small) array
    else:
        # >= 2 row tiles when possible so v7x's two TensorCores split the rows.
        tb = min(tb_cap, _round_up(pl.cdiv(bp, 2), sub))
    grid_b = pl.cdiv(bp, tb)

    out_packed = pl.pallas_call(
        packed_linear_kernel,
        out_shape=jax.ShapeDtypeStruct((bp, np_), x.dtype),
        grid=(grid_b,),
        in_specs=[
            pl.BlockSpec((tb, kp), lambda i: (i, 0)),      # streamed packed x rows
            pl.BlockSpec((kp, np_), lambda i: (0, 0)),     # resident packed weight
            pl.BlockSpec((1, np_), lambda i: (0, 0)),      # resident packed bias
        ],
        out_specs=pl.BlockSpec((tb, np_), lambda i: (i, 0)),
        compiler_params=pltpu.CompilerParams(
            dimension_semantics=("parallel",),             # shard row tiles (v7x 2 TCs)
            vmem_limit_bytes=32 * 1024 * 1024,             # lift v5e's 16 MiB scoped default
        ),
    )(x_packed, w_packed, b_packed)

    out_main = out_packed.reshape(b_main, osize)           # pure bitcast
    if b_main == B:
        return out_main
    # < pack leftover rows: negligible, plain XLA.
    out_tail = (x[b_main:] @ weight.T + bias).astype(x.dtype)
    return jnp.concatenate([out_main, out_tail], axis=0)


if __name__ == "__main__":
    # Shapes consistent with the module: isize=32, hsize=64 (unused by forward), osize=16.
    B, isize, hsize, osize = 8, 32, 64, 16

    key = jax.random.PRNGKey(0)
    kx, kw, kb, kx2 = jax.random.split(key, 4)

    x = jax.random.normal(kx, (B, isize), dtype=jnp.float32)
    bound = 1.0 / (isize ** 0.5)
    weight = jax.random.uniform(kw, (osize, isize), minval=-bound, maxval=bound,
                                dtype=jnp.float32)
    bias = jax.random.uniform(kb, (osize,), minval=-bound, maxval=bound,
                              dtype=jnp.float32)

    out = multivariate_regression_forward(x, weight, bias)
    out = jax.block_until_ready(out)
    ref = x @ weight.T + bias
    assert out.shape == (B, osize)
    assert jnp.allclose(out, ref, atol=1e-5, rtol=1e-5)

    # Multi-tile grid + unpackable-tail path (B2 = 16 packed rows + 4 tail rows).
    B2 = 132
    x2 = jax.random.normal(kx2, (B2, isize), dtype=jnp.float32)
    out2 = multivariate_regression_forward(x2, weight, bias, block_b=64)
    out2 = jax.block_until_ready(out2)
    ref2 = x2 @ weight.T + bias
    assert out2.shape == (B2, osize)
    assert jnp.allclose(out2, ref2, atol=1e-5, rtol=1e-5)

    print("KERNEL_OK")
</pallas_src>

<mosaic_0001>
module attributes {stable_mosaic.version = 11 : i64} {
  func.func @packed_linear_kernel(%arg0: i32, %arg1: memref<1x256xf32, #tpu.memory_space<vmem>>, %arg2: memref<256x128xf32, #tpu.memory_space<vmem>>, %arg3: memref<1x128xf32, #tpu.memory_space<vmem>>, %arg4: memref<1x128xf32, #tpu.memory_space<vmem>>) attributes {dimension_semantics = [#tpu.dimension_semantics<parallel>], iteration_bounds = array<i64: 1>, scalar_prefetch = 0 : i64, scratch_operands = 0 : i64, tpu.core_type = #tpu.core_type<tc>, window_params = [{transform_indices = @transform_0, window_bounds = array<i64: 1, 256>}, {pipeline_mode = #tpu.pipeline_mode<synchronous>, transform_indices = @transform_1, window_bounds = array<i64: 256, 128>}, {pipeline_mode = #tpu.pipeline_mode<synchronous>, transform_indices = @transform_2, window_bounds = array<i64: 1, 128>}, {transform_indices = @transform_3, window_bounds = array<i64: 1, 128>}]} {
    %c0 = arith.constant 0 : index
    %c0_0 = arith.constant 0 : index
    %0 = vector.load %arg1[%c0, %c0_0] : memref<1x256xf32, #tpu.memory_space<vmem>>, vector<1x256xf32>
    %c0_1 = arith.constant 0 : index
    %c0_2 = arith.constant 0 : index
    %1 = vector.load %arg2[%c0_1, %c0_2] : memref<256x128xf32, #tpu.memory_space<vmem>>, vector<256x128xf32>
    %cst = arith.constant dense<0.000000e+00> : vector<1x128xf32>
    %2 = tpu.matmul %0, %1, %cst {dimension_numbers = #tpu.dot_dimension_numbers<[1], [0], [0], [1], [0, 0, 1, 1], [], []>} : vector<1x256xf32>, vector<256x128xf32>, vector<1x128xf32> -> vector<1x128xf32>
    %c0_3 = arith.constant 0 : index
    %c0_4 = arith.constant 0 : index
    %3 = vector.load %arg3[%c0_3, %c0_4] : memref<1x128xf32, #tpu.memory_space<vmem>>, vector<1x128xf32>
    %4 = arith.addf %2, %3 : vector<1x128xf32>
    %c0_5 = arith.constant 0 : index
    %c0_6 = arith.constant 0 : index
    %5 = vector.load %arg4[%c0_5, %c0_6] : memref<1x128xf32, #tpu.memory_space<vmem>>, vector<1x128xf32>
    tpu.vector_store %arg4[%c0_5, %c0_6], %4 {strides = array<i32>} : memref<1x128xf32, #tpu.memory_space<vmem>>, vector<1x128xf32>,
    return
  }
  func.func @transform_0(%arg0: i32) -> (i32, i32) {
    %c0_i32 = arith.constant 0 : i32
    %c0_i32_0 = arith.constant 0 : i32
    return %arg0, %c0_i32 : i32, i32
  }
  func.func @transform_1(%arg0: i32) -> (i32, i32) {
    %c0_i32 = arith.constant 0 : i32
    %c0_i32_0 = arith.constant 0 : i32
    %c0_i32_1 = arith.constant 0 : i32
    return %c0_i32, %c0_i32_0 : i32, i32
  }
  func.func @transform_2(%arg0: i32) -> (i32, i32) {
    %c0_i32 = arith.constant 0 : i32
    %c0_i32_0 = arith.constant 0 : i32
    %c0_i32_1 = arith.constant 0 : i32
    return %c0_i32, %c0_i32_0 : i32, i32
  }
  func.func @transform_3(%arg0: i32) -> (i32, i32) {
    %c0_i32 = arith.constant 0 : i32
    %c0_i32_0 = arith.constant 0 : i32
    return %arg0, %c0_i32 : i32, i32
  }
}

</mosaic_0001>

<bundles_post_ra>
// kernel: tile.8
= control target key start
LH: loop header
LB: loop body
LE: loop exit
PB: predicated region body
PF: predicated region fallthrough
CT: control target
= control target key end

     0   :  { %s22_s0 = inlined_call_operand.vmem [shape: f32[16], index: 0, kind: input, shape index: {}]   ;;  %s23_s1 = inlined_call_operand.vmem [shape: f32[8,16], index: 1, kind: output, shape index: {}]  }
   0x1   :  { %v4_v0 = vld [vmem:[%s22_s0] ss:$0 sm:$0xff] }
   0x2   :  { %5 = vst [vmem:[%s23_s1] sm:$0xff] %v4_v0 }

// kernel: tile.9
= control target key start
LH: loop header
LB: loop body
LE: loop exit
PB: predicated region body
PF: predicated region fallthrough
CT: control target
= control target key end

     0   :  { %s67_s10 = smov 112   ;;  %s68_s11 = smov 80   ;;  %vm3_vm0 = vcmask 130048   ;;  %vm9_vm1 = vcmask 1048448   ;;  %vm15_vm2 = vcmask 917248   ;;  %vm21_vm3 = vcmask 786048   ;;  %s111_s0 = inlined_call_operand.vmem [shape: f32[8,16], index: 0, kind: input, shape index: {}]   ;;  %s112_s1 = inlined_call_operand.vmem [shape: f32[1,128], index: 1, kind: output, shape index: {}]  }
   0x1   :  { %v53_v0 = vld [vmem:[%s111_s0 + $0x7] sm:$0x1]   ;;  %v55_v1 = vld [vmem:[%s111_s0 + $0x5] sm:$0x1]   ;;  %v57_v2 = vld [vmem:[%s111_s0 + $0x3] sm:$0x1]  }
   0x2   :  { %7 = vrot.lane.b32.xlu0 %v53_v0, %s67_s10  ;;  %19 = vrot.lane.b32.xlu1 %v55_v1, %s68_s11  ;;  %s69_s14 = smov 48   ;;  %v54_v3 = vld [vmem:[%s111_s0 + $0x6] sm:$0x1]   ;;  %v56_v4 = vld [vmem:[%s111_s0 + $0x4] sm:$0x1]   ;;  %s70_s21 = smov 96  }
   0x3   :  { %31 = vrot.lane.b32.xlu2 %v57_v2, %s69_s14  ;;  %v58_v5 = vld [vmem:[%s111_s0 + $0x2] sm:$0x1]   ;;  %s71_s22 = smov 64   ;;  %s72_s23 = smov 32   ;;  %v59_v6 = vld [vmem:[%s111_s0 + $0x1] sm:$0x1]  }
   0x4   :  { %s73_s26 = smov 16   ;;  %v2_v7 = vld [vmem:[%s111_s0] sm:$0x1]   ;;  %vm27_vm4 = vcmask 654848   ;;  %vm33_vm5 = vcmask 523648   ;;  %vm39_vm6 = vcmask 392448  }
   0x5   :  { %4 = vst.msk [vmem:[#allocation0] sm:$0x1] %vm3_vm0, %v2_v7   ;;  %vm45_vm7 = vcmask 261248  }
   0xa   :  { %13 = vrot.lane.b32.xlu0 %v54_v3, %s70_s21  ;;  %25 = vrot.lane.b32.xlu1 %v56_v4, %s71_s22 }
   0xb   :  { %37 = vrot.lane.b32.xlu2 %v58_v5, %s72_s23 }
  0x12   :  { %43 = vrot.lane.b32.xlu0 %v59_v6, %s73_s26 }
  0x5d   :  { %v32_v8 = vpop.permute.xlu2 %31  }
  0x65   :  { %v38_v9 = vpop.permute.xlu2 %37  }
  0x74   :  { %v8_v10 = vpop.permute.xlu0 %7   ;;  %v20_v11 = vpop.permute.xlu1 %19  }
  0x75   :  { %10 = vst.msk [vmem:[#allocation0] sm:$0x1] %vm9_vm1, %v8_v10  }
  0x7c   :  { %v14_v12 = vpop.permute.xlu0 %13   ;;  %v26_v13 = vpop.permute.xlu1 %25  }
  0x7d   :  { %16 = vst.msk [vmem:[#allocation0] sm:$0x1] %vm15_vm2, %v14_v12  }
  0x7e   :  { %22 = vst.msk [vmem:[#allocation0] sm:$0x1] %vm21_vm3, %v20_v11  }
  0x7f   :  { %28 = vst.msk [vmem:[#allocation0] sm:$0x1] %vm27_vm4, %v26_v13  }
  0x80   :  { %34 = vst.msk [vmem:[#allocation0] sm:$0x1] %vm33_vm5, %v32_v8  }
  0x81   :  { %40 = vst.msk [vmem:[#allocation0] sm:$0x1] %vm39_vm6, %v38_v9  }
  0x84   :  { %v44_v14 = vpop.permute.xlu0 %43  }
  0x85   :  { %46 = vst.msk [vmem:[#allocation0] sm:$0x1] %vm45_vm7, %v44_v14  }
  0x8c   :  { %v49_v15 = vld [vmem:[#allocation0] sm:$0x1] }
  0x8d   :  { %52 = vst [vmem:[%s112_s1] sm:$0x1] %v49_v15 }

// kernel: multivariate_regression_forward.1
= control target key start
LH: loop header
LB: loop body
LE: loop exit
PB: predicated region body
PF: predicated region fallthrough
CT: control target
= control target key end

     0   :  { %s223_s1 = inlined_call_operand.vmem [shape: f32[256,128], index: 1, kind: input, shape index: {}]   ;;  %s224_s0 = inlined_call_operand.vmem [shape: f32[1,256], index: 0, kind: input, shape index: {}]   ;;  %s225_s2 = inlined_call_operand.vmem [shape: f32[1,128], index: 2, kind: input, shape index: {}]   ;;  %s226_s3 = inlined_call_operand.vmem [shape: f32[1,128], index: 3, kind: output, shape index: {}]  }
   0x1   :  { %v30_v0 = vld [vmem:[%s223_s1 + $0x78] sm:$0xff]  ;;  %v29_v1 = vld [vmem:[%s223_s1 + $0x70] sm:$0xff]  ;;  %v28_v4 = vld [vmem:[%s223_s1 + $0x68] sm:$0xff] }
   0x2   :  { %v46_v2 = vld [vmem:[%s223_s1 + $0xf8] sm:$0xff]  ;;  %53 = vmatpush.msra.mxu0 %v30_v0  ;;  %v45_v3 = vld [vmem:[%s223_s1 + $0xf0] sm:$0xff]  ;;  %v44_v5 = vld [vmem:[%s223_s1 + $0xe8] sm:$0xff] }
   0x3   :  { %73 = vmatpush.msra.mxu1 %v46_v2  ;;  %v27_v6 = vld [vmem:[%s223_s1 + $0x60] sm:$0xff]  ;;  %v26_v8 = vld [vmem:[%s223_s1 + $0x58] sm:$0xff]  ;;  %v25_v10 = vld [vmem:[%s223_s1 + $0x50] sm:$0xff] }
   0x4   :  { %54 = vmatpush.msra.mxu0 %v29_v1  ;;  %v43_v7 = vld [vmem:[%s223_s1 + $0xe0] sm:$0xff]  ;;  %v42_v9 = vld [vmem:[%s223_s1 + $0xd8] sm:$0xff]  ;;  %v41_v11 = vld [vmem:[%s223_s1 + $0xd0] sm:$0xff] }
   0x5   :  { %74 = vmatpush.msra.mxu1 %v45_v3  ;;  %v24_v12 = vld [vmem:[%s223_s1 + $0x48] sm:$0xff]  ;;  %v23_v14 = vld [vmem:[%s223_s1 + $0x40] sm:$0xff]  ;;  %v22_v16 = vld [vmem:[%s223_s1 + $0x38] sm:$0xff] }
   0x6   :  { %55 = vmatpush.msra.mxu0 %v28_v4  ;;  %v40_v13 = vld [vmem:[%s223_s1 + $0xc8] sm:$0xff]  ;;  %v39_v15 = vld [vmem:[%s223_s1 + $0xc0] sm:$0xff]  ;;  %v38_v17 = vld [vmem:[%s223_s1 + $0xb8] sm:$0xff] }
   0x7   :  { %75 = vmatpush.msra.mxu1 %v44_v5  ;;  %v21_v18 = vld [vmem:[%s223_s1 + $0x30] sm:$0xff]  ;;  %v20_v20 = vld [vmem:[%s223_s1 + $0x28] sm:$0xff]  ;;  %v19_v22 = vld [vmem:[%s223_s1 + $0x20] sm:$0xff] }
   0x8   :  { %56 = vmatpush.msra.mxu0 %v27_v6  ;;  %v37_v19 = vld [vmem:[%s223_s1 + $0xb0] sm:$0xff]  ;;  %v36_v21 = vld [vmem:[%s223_s1 + $0xa8] sm:$0xff]  ;;  %v35_v23 = vld [vmem:[%s223_s1 + $0xa0] sm:$0xff] }
   0x9   :  { %76 = vmatpush.msra.mxu1 %v43_v7  ;;  %v18_v24 = vld [vmem:[%s223_s1 + $0x18] sm:$0xff]  ;;  %v17_v26 = vld [vmem:[%s223_s1 + $0x10] sm:$0xff]  ;;  %v14_v28 = vld [vmem:[%s224_s0] sm:$0x3] }
   0xa   :  { %57 = vmatpush.msra.mxu0 %v26_v8  ;;  %v34_v25 = vld [vmem:[%s223_s1 + $0x98] sm:$0xff]  ;;  %v33_v27 = vld [vmem:[%s223_s1 + $0x90] sm:$0xff]  ;;  %v16_v29 = vld [vmem:[%s223_s1 + $0x8] sm:$0xff]  ;;  %v49_v32 = vperm.slane %v14_v28, 0  ;;  %v50_v34 = vperm.slane %v14_v28, 1 }
   0xb   :  { %77 = vmatpush.msra.mxu1 %v42_v9  ;;  %v32_v30 = vld [vmem:[%s223_s1 + $0x88] sm:$0xff]  ;;  %v15_v31 = vld [vmem:[%s223_s1] sm:$0xff] }
   0xc   :  { %58 = vmatpush.msra.mxu0 %v25_v10  ;;  %v31_v33 = vld [vmem:[%s223_s1 + $0x80] sm:$0xff] }
   0xd   :  { %78 = vmatpush.msra.mxu1 %v41_v11  ;;  %v47_v35 = vld [vmem:[%s225_s2] sm:$0x1] }
   0xe   :  { %59 = vmatpush.msra.mxu0 %v24_v12 }
   0xf   :  { %79 = vmatpush.msra.mxu1 %v40_v13 }
  0x10   :  { %60 = vmatpush.msra.mxu0 %v23_v14 }
  0x11   :  { %80 = vmatpush.msra.mxu1 %v39_v15 }
  0x12   :  { %61 = vmatpush.msra.mxu0 %v22_v16 }
  0x13   :  { %81 = vmatpush.msra.mxu1 %v38_v17 }
  0x14   :  { %62 = vmatpush.msra.mxu0 %v21_v18 }
  0x15   :  { %82 = vmatpush.msra.mxu1 %v37_v19 }
  0x16   :  { %63 = vmatpush.msra.mxu0 %v20_v20 }
  0x17   :  { %83 = vmatpush.msra.mxu1 %v36_v21 }
  0x18   :  { %64 = vmatpush.msra.mxu0 %v19_v22 }
  0x19   :  { %84 = vmatpush.msra.mxu1 %v35_v23 }
  0x1a   :  { %65 = vmatpush.msra.mxu0 %v18_v24 }
  0x1b   :  { %85 = vmatpush.msra.mxu1 %v34_v25 }
  0x1c   :  { %66 = vmatpush.msra.mxu0 %v17_v26 }
  0x1d   :  { %86 = vmatpush.msra.mxu1 %v33_v27 }
  0x1e   :  { %67 = vmatpush.msra.mxu0 %v16_v29 }
  0x1f   :  { %87 = vmatpush.msra.mxu1 %v32_v30 }
  0x20   :  { %68 = vmatpush.msra.mxu0 %v15_v31 }
  0x21   :  { %88 = vmatpush.msra.mxu1 %v31_v33  ;;  %69 = vmatmul.f32.vlgmr.msra.gmra.mxu0 %v49_v32 }
  0x22   :  { %89 = vmatmul.f32.vlgmr.msra.gmra.mxu1 %v50_v34 }
  0x9e   :  { %v70_v36 = vpop.f32.mrf.mxu0 }
  0x9f   :  { %v90_v37 = vpop.f32.mrf.mxu1  ;;  %v71_v38 = vadd.f32 %v70_v36, %v47_v35 }
  0xa1   :  { %v91_v39 = vadd.f32 %v90_v37, %v71_v38 }
  0xa3   :  { %93 = vst [vmem:[%s226_s3] sm:$0x1] %v91_v39 }

</bundles_post_ra>
